<compile_context>
chip_gen: v6e
topology: v6e:2x2x1
jax: 0.10.0
libtpu: 0.0.40
codegen_flags: <defaults>
</compile_context>

<pallas_src>
import functools

import jax
import jax.numpy as jnp
from jax.experimental import pallas as pl
from jax.experimental.pallas import tpu as pltpu


EPS = 1e-5


def _round_up(x, n):
    return (x + n - 1) // n * n


# ----------------------------------------------------------------------------
# Pass 1: tiled conv matmul + per-tile per-channel sum / sum-of-squares.
# No cross-tile carry -> the M axis is "parallel" (megacore-shardable on v7x).
# ----------------------------------------------------------------------------
def _conv_stats_kernel(patches_ref, w_ref, conv_ref, stats_ref):
    # bf16 operands, f32 accumulation on the MXU.
    acc = jnp.dot(patches_ref[...], w_ref[...],
                  preferred_element_type=jnp.float32)            # (TM, Cp) f32
    conv_ref[...] = acc.astype(conv_ref.dtype)                   # bf16 inter-pass buffer

    # Per-tile partial statistics, reduced from the f32 accumulator.
    s = jnp.sum(acc, axis=0, keepdims=True)                      # (1, Cp)
    ss = jnp.sum(acc * acc, axis=0, keepdims=True)               # (1, Cp)
    stats_ref[...] = jnp.concatenate([s, ss], axis=0)[None]      # (1, 2, Cp)


# ----------------------------------------------------------------------------
# Pass 2: tiled fused normalize (single FMA) + ReLU.  Purely HBM-bound.
# ----------------------------------------------------------------------------
def _bn_relu_kernel(conv_ref, scale_ref, shift_ref, o_ref, *, activation):
    y = conv_ref[...].astype(jnp.float32) * scale_ref[...] + shift_ref[...]
    if activation:
        y = jnp.maximum(y, 0.0)
    o_ref[...] = y.astype(o_ref.dtype)


# ----------------------------------------------------------------------------
# im2col (HBM-side, bf16).  Row index order: (ki*kw + kj)*Cin + c, matching
# weight.transpose(2, 3, 1, 0).reshape(-1, Cout).
# ----------------------------------------------------------------------------
def _im2col_nhwc(x_nchw, kh, kw, stride, padding):
    n, cin, h, w = x_nchw.shape
    x = jnp.transpose(x_nchw, (0, 2, 3, 1))                      # NHWC
    x = jnp.pad(x, ((0, 0), (padding, padding), (padding, padding), (0, 0)))
    ho = (h + 2 * padding - kh) // stride + 1
    wo = (w + 2 * padding - kw) // stride + 1
    pieces = []
    for ki in range(kh):
        for kj in range(kw):
            pieces.append(
                x[:, ki:ki + (ho - 1) * stride + 1:stride,
                  kj:kj + (wo - 1) * stride + 1:stride, :])       # (N,Ho,Wo,Cin)
    patches = jnp.concatenate(pieces, axis=-1)                    # (N,Ho,Wo,kh*kw*Cin)
    return patches.reshape(n * ho * wo, kh * kw * cin), (n, ho, wo)


# ----------------------------------------------------------------------------
# Generation-aware VMEM budgeting.
# ----------------------------------------------------------------------------
def _vmem_config():
    """Returns (vmem_limit_bytes, tile_budget_bytes)."""
    phys = None
    try:
        phys = int(pltpu.get_tpu_info().vmem_capacity_bytes)
    except Exception:
        phys = None
    if phys is not None and phys >= 128 * 1024 * 1024:
        # v5e / v6e: 128 MiB physical VMEM -> larger tiles, fewer grid steps.
        return 64 * 1024 * 1024, 48 * 1024 * 1024
    # v7x (64 MiB physical / 32 MiB scoped) or unknown: stay conservative.
    return 32 * 1024 * 1024, 20 * 1024 * 1024


def _pick_tm(m, k, cp, tile_budget_bytes):
    """Largest 256-multiple M tile whose double-buffered pass-1 / pass-2 working set
    (plus the single-buffered resident blocks) fits the VMEM budget."""
    # Resident (constant block index => single-buffered) blocks:
    #   weight (k, cp) bf16, per-tile stats (1,2,cp) f32, pass-2 scale/shift (1,cp) f32.
    resident = k * cp * 2 + 2 * cp * 4 + 2 * cp * 4
    budget = max(tile_budget_bytes - resident, 1 << 20)
    per_row = max(
        2 * (k * 2 + cp * 2),    # pass 1: bf16 patch row + bf16 conv row, x2 buffers
        2 * (cp * 2 + cp * 4),   # pass 2: bf16 conv row + f32 out row,    x2 buffers
    )
    tm = (budget // per_row) // 256 * 256
    return int(max(256, min(tm, 4096)))


def conv_block(x_nchw, weight, bias, gamma, beta, *, stride, padding,
               activation=True, tm=None, out_layout="NCHW"):
    """weight: (Cout, Cin, kh, kw) like PyTorch; returns float32 in `out_layout`.

    `bias` is accepted for interface parity but not used: under training-mode
    BatchNorm a per-channel constant is exactly canceled by the mean subtraction.
    """
    del bias
    cout, cin, kh, kw = weight.shape

    # bf16 patch matrix (halves HBM traffic of the materialized im2col tensor).
    patches, (n, ho, wo) = _im2col_nhwc(x_nchw.astype(jnp.bfloat16),
                                        kh, kw, stride, padding)
    m, k = patches.shape

    # Lane-dense output channels; K is left unpadded (full-extent block).
    cp = _round_up(cout, 128)

    vmem_limit, tile_budget = _vmem_config()
    if tm is None:
        tm = _pick_tm(m, k, cp, tile_budget)
    tm = max(256, int(tm) // 256 * 256)            # full MXU passes, bf16 sublane packing
    tm = min(tm, _round_up(m, 256))
    m_pad = _round_up(m, tm)
    num_tiles = m_pad // tm
    grid = (num_tiles,)

    # Pad M only when needed (zero rows contribute nothing to the BN sums).
    patches_p = patches if m_pad == m else jnp.pad(patches, ((0, m_pad - m), (0, 0)))
    w_mat = jnp.transpose(weight, (2, 3, 1, 0)).reshape(k, cout)
    w_p = jnp.pad(w_mat.astype(jnp.bfloat16), ((0, 0), (0, cp - cout)))

    # ---- Pass 1: conv matmul + per-tile per-channel sum / sumsq (fully parallel) ----
    conv_out, stats = pl.pallas_call(
        _conv_stats_kernel,
        out_shape=(jax.ShapeDtypeStruct((m_pad, cp), jnp.bfloat16),
                   jax.ShapeDtypeStruct((num_tiles, 2, cp), jnp.float32)),
        grid=grid,
        in_specs=[
            pl.BlockSpec((tm, k), lambda i: (i, 0)),      # full-K block (no HBM K pad)
            pl.BlockSpec((k, cp), lambda i: (0, 0)),      # resident weight tile
        ],
        out_specs=(
            pl.BlockSpec((tm, cp), lambda i: (i, 0)),
            pl.BlockSpec((1, 2, cp), lambda i: (i, 0, 0)),  # per-tile partial stats
        ),
        compiler_params=pltpu.CompilerParams(
            dimension_semantics=("parallel",),            # megacore-shardable on v7x
            vmem_limit_bytes=vmem_limit),
        cost_estimate=pl.CostEstimate(
            flops=2 * m_pad * k * cp,
            transcendentals=0,
            bytes_accessed=(m_pad * k * 2 + k * cp * 2 + m_pad * cp * 2
                            + num_tiles * 2 * cp * 4)),
    )(patches_p, w_p)

    # ---- Tiny per-channel BN epilogue (Cout elements) folded to one FMA ----
    # NOTE: E[x^2]-E[x]^2 in f32 is adequate here; for very large M / large-mean
    # activations a Welford-style combine of the per-tile partials would be safer.
    ch_sum = jnp.sum(stats[:, 0, :], axis=0, keepdims=True)       # (1, Cp)
    ch_sumsq = jnp.sum(stats[:, 1, :], axis=0, keepdims=True)     # (1, Cp)
    inv_m = 1.0 / float(m)                                        # true (unpadded) count
    mean = ch_sum * inv_m
    var = jnp.maximum(ch_sumsq * inv_m - mean * mean, 0.0)        # biased variance
    gamma_p = jnp.zeros((1, cp), jnp.float32).at[0, :cout].set(gamma.astype(jnp.float32))
    beta_p = jnp.zeros((1, cp), jnp.float32).at[0, :cout].set(beta.astype(jnp.float32))
    scale = gamma_p * jax.lax.rsqrt(var + EPS)                    # padded channels -> 0
    shift = beta_p - mean * scale

    # ---- Pass 2: tiled normalize + ReLU (fully parallel over M tiles) ----
    out_flat = pl.pallas_call(
        functools.partial(_bn_relu_kernel, activation=activation),
        out_shape=jax.ShapeDtypeStruct((m_pad, cp), jnp.float32),
        grid=grid,
        in_specs=[
            pl.BlockSpec((tm, cp), lambda i: (i, 0)),
            pl.BlockSpec((1, cp), lambda i: (0, 0)),
            pl.BlockSpec((1, cp), lambda i: (0, 0)),
        ],
        out_specs=pl.BlockSpec((tm, cp), lambda i: (i, 0)),
        compiler_params=pltpu.CompilerParams(
            dimension_semantics=("parallel",),
            vmem_limit_bytes=vmem_limit),
    )(conv_out, scale, shift)

    out = out_flat[:m, :cout].reshape(n, ho, wo, cout)            # NHWC
    if out_layout == "NHWC":
        return out
    return jnp.transpose(out, (0, 3, 1, 2))                       # NCHW (module semantics)


# ----------------------------------------------------------------------------
# Pure-JAX reference (exact module semantics).
# ----------------------------------------------------------------------------
def _reference(x_nchw, weight, bias, gamma, beta, *, stride, padding,
               activation=True):
    y = jax.lax.conv_general_dilated(
        x_nchw, weight, window_strides=(stride, stride),
        padding=[(padding, padding), (padding, padding)],
        dimension_numbers=("NCHW", "OIHW", "NCHW"))
    y = y + bias.reshape(1, -1, 1, 1)
    mean = jnp.mean(y, axis=(0, 2, 3), keepdims=True)
    var = jnp.mean(jnp.square(y - mean), axis=(0, 2, 3), keepdims=True)
    y = (y - mean) * jax.lax.rsqrt(var + EPS)
    y = y * gamma.reshape(1, -1, 1, 1) + beta.reshape(1, -1, 1, 1)
    return jnp.maximum(y, 0.0) if activation else y


if __name__ == "__main__":
    # ConvBlock(in_channels=4, out_channels=8, kernel_size=3, stride=1, padding=1)
    in_channels, out_channels, kernel_size, stride, padding = 4, 8, 3, 1, 1
    N, H, W = 2, 16, 16

    key = jax.random.PRNGKey(0)
    kx, kwk = jax.random.split(key)
    x = jax.random.normal(kx, (N, in_channels, H, W), dtype=jnp.float32)

    # Deterministic init matching initializeConv: N(0, sqrt(2/(k^2*Cout))), bias=0.
    init_std = jnp.sqrt(2.0 / (kernel_size ** 2 * out_channels))
    weight = init_std * jax.random.normal(
        kwk, (out_channels, in_channels, kernel_size, kernel_size), dtype=jnp.float32)
    bias = jnp.zeros((out_channels,), jnp.float32)
    gamma = jnp.ones((out_channels,), jnp.float32)   # BatchNorm2d weight init
    beta = jnp.zeros((out_channels,), jnp.float32)   # BatchNorm2d bias init

    # tm=256 -> M = 2*16*16 = 512 splits into 2 tiles: exercises the per-tile
    # partial-stats path and the cross-tile reduction in the epilogue.
    out = conv_block(x, weight, bias, gamma, beta,
                     stride=stride, padding=padding, activation=True, tm=256)
    out = jax.block_until_ready(out)
    assert out.shape == (N, out_channels, H, W)

    # Check against a reference seeing the same bf16-rounded MXU operands
    # (isolates the tiling / two-pass BN / ReLU logic; tolerance covers the
    # bf16 inter-pass conv buffer).
    x_q = x.astype(jnp.bfloat16).astype(jnp.float32)
    w_q = weight.astype(jnp.bfloat16).astype(jnp.float32)
    ref_q = _reference(x_q, w_q, bias, gamma, beta,
                       stride=stride, padding=padding, activation=True)
    assert jnp.allclose(out, ref_q, atol=2e-2, rtol=2e-2)

    # Looser check against the exact f32 module semantics.
    ref = _reference(x, weight, bias, gamma, beta,
                     stride=stride, padding=padding, activation=True)
    assert jnp.allclose(out, ref, atol=5e-2, rtol=5e-2)

    print("KERNEL_OK")
</pallas_src>

<mosaic_0001>
module attributes {stable_mosaic.version = 11 : i64} {
  func.func @_conv_stats_kernel(%arg0: i32, %arg1: memref<256x36xbf16, #tpu.memory_space<vmem>>, %arg2: memref<36x128xbf16, #tpu.memory_space<vmem>>, %arg3: memref<256x128xbf16, #tpu.memory_space<vmem>>, %arg4: memref<1x2x128xf32, #tpu.memory_space<vmem>>) attributes {dimension_semantics = [#tpu.dimension_semantics<parallel>], iteration_bounds = array<i64: 2>, scalar_prefetch = 0 : i64, scratch_operands = 0 : i64, tpu.core_type = #tpu.core_type<tc>, window_params = [{transform_indices = @transform_0, window_bounds = array<i64: 256, 36>}, {pipeline_mode = #tpu.pipeline_mode<synchronous>, transform_indices = @transform_1, window_bounds = array<i64: 36, 128>}, {transform_indices = @transform_2, window_bounds = array<i64: 256, 128>}, {transform_indices = @transform_3, window_bounds = array<i64: 1, 2, 128>}]} {
    %c0 = arith.constant 0 : index
    %c0_0 = arith.constant 0 : index
    %0 = vector.load %arg1[%c0, %c0_0] : memref<256x36xbf16, #tpu.memory_space<vmem>>, vector<256x36xbf16>
    %c0_1 = arith.constant 0 : index
    %c0_2 = arith.constant 0 : index
    %1 = vector.load %arg2[%c0_1, %c0_2] : memref<36x128xbf16, #tpu.memory_space<vmem>>, vector<36x128xbf16>
    %cst = arith.constant dense<0.000000e+00> : vector<256x128xf32>
    %2 = tpu.matmul %0, %1, %cst {dimension_numbers = #tpu.dot_dimension_numbers<[1], [0], [0], [1], [0, 0, 1, 1], [], []>} : vector<256x36xbf16>, vector<36x128xbf16>, vector<256x128xf32> -> vector<256x128xf32>
    %3 = arith.truncf %2 : vector<256x128xf32> to vector<256x128xbf16>
    %c0_3 = arith.constant 0 : index
    %c0_4 = arith.constant 0 : index
    %4 = vector.load %arg3[%c0_3, %c0_4] : memref<256x128xbf16, #tpu.memory_space<vmem>>, vector<256x128xbf16>
    tpu.vector_store %arg3[%c0_3, %c0_4], %3 {strides = array<i32>} : memref<256x128xbf16, #tpu.memory_space<vmem>>, vector<256x128xbf16>,
    %cst_5 = arith.constant dense<0.000000e+00> : vector<128xf32>
    %5 = vector.multi_reduction <add>, %2, %cst_5 [0] : vector<256x128xf32> to vector<128xf32>
    %6 = vector.shape_cast %5 : vector<128xf32> to vector<1x128xf32>
    %7 = arith.mulf %2, %2 : vector<256x128xf32>
    %cst_6 = arith.constant dense<0.000000e+00> : vector<128xf32>
    %8 = vector.multi_reduction <add>, %7, %cst_6 [0] : vector<256x128xf32> to vector<128xf32>
    %9 = vector.shape_cast %8 : vector<128xf32> to vector<1x128xf32>
    %10 = tpu.concatenate %6, %9 in 0 : vector<1x128xf32>, vector<1x128xf32> -> vector<2x128xf32>
    %11 = vector.shape_cast %10 : vector<2x128xf32> to vector<1x2x128xf32>
    %c0_7 = arith.constant 0 : index
    %c0_8 = arith.constant 0 : index
    %c0_9 = arith.constant 0 : index
    %12 = vector.load %arg4[%c0_7, %c0_8, %c0_9] : memref<1x2x128xf32, #tpu.memory_space<vmem>>, vector<1x2x128xf32>
    tpu.vector_store %arg4[%c0_7, %c0_8, %c0_9], %11 {strides = array<i32>} : memref<1x2x128xf32, #tpu.memory_space<vmem>>, vector<1x2x128xf32>,
    return
  }
  func.func @transform_0(%arg0: i32) -> (i32, i32) {
    %c0_i32 = arith.constant 0 : i32
    %c0_i32_0 = arith.constant 0 : i32
    return %arg0, %c0_i32 : i32, i32
  }
  func.func @transform_1(%arg0: i32) -> (i32, i32) {
    %c0_i32 = arith.constant 0 : i32
    %c0_i32_0 = arith.constant 0 : i32
    %c0_i32_1 = arith.constant 0 : i32
    return %c0_i32, %c0_i32_0 : i32, i32
  }
  func.func @transform_2(%arg0: i32) -> (i32, i32) {
    %c0_i32 = arith.constant 0 : i32
    %c0_i32_0 = arith.constant 0 : i32
    return %arg0, %c0_i32 : i32, i32
  }
  func.func @transform_3(%arg0: i32) -> (i32, i32, i32) {
    %c0_i32 = arith.constant 0 : i32
    %c0_i32_0 = arith.constant 0 : i32
    %c0_i32_1 = arith.constant 0 : i32
    return %arg0, %c0_i32, %c0_i32_0 : i32, i32, i32
  }
}

</mosaic_0001>

<bundles_post_ra>
// kernel: tpu_custom_call.1
= control target key start
LH: loop header
LB: loop body
LE: loop exit
PB: predicated region body
PF: predicated region fallthrough
CT: control target
= control target key end

     0   :  { %9 = vsyncpa [#allocation3], 0  ;;  %s1671_s0 = inlined_call_operand.vmem [shape: bf16[512,36], index: 0, kind: input, shape index: {}]   ;;  %s1672_s1 = inlined_call_operand.vmem [shape: bf16[36,128], index: 1, kind: input, shape index: {}]   ;;  %s1673_s2 = inlined_call_operand.hbm [shape: bf16[512,128], index: 2, kind: output, shape index: {0}]   ;;  %s1674_s3 = inlined_call_operand.hbm [shape: f32[2,2,128], index: 3, kind: output, shape index: {1}]  }
   0x1   :  { %11 = vsyncpa [#allocation3 + $0x1], 0 }
   0x2   :  { %12 = vsyncpa [#allocation5], 0 }
   0x3   :  { %14 = vsyncpa [#allocation5 + $0x1], 0  ;;  %s1381_s12 = smov 0   ;;  %s1383_s13 = smov 0  }
   0x4   :  { %s1385_s14 = smov 0   ;;  %s1387_s15 = smov 0  }
   0x5 LB: > { %s1402_s16 = sadd.s32 4294967295, %s1355_s15   ;;  %s925_s17 = sadd.s32 4294967294, %s1355_s15   ;;  %s1355_s15 = sphi %s1387_s15, %s1680_s15   ;;  %s1351_s14 = sphi %s1385_s14, %s1679_s14   ;;  %s1347_s13 = sphi %s1383_s13, %s1678_s13   ;;  %s1343_s12 = sphi %s1381_s12, %s1677_s12  }
   0x6   : > { %s1406_s18 = sadd.s32 1, %s1355_s15   ;;  %s74_s19 = sadd.s32 1, %s1351_s14 }
   0x7   : > { %s71_s20 = ssub.s32 %s1355_s15, %s1406_s18  ;;  %p84_p0 = scmp.ne.s32.totalorder %s1351_s14, %s1347_s13 }
   0x8   : > { %p72_p1 = scmp.eq.s32.totalorder %s71_s20, 0  ;;  %p85_p2 = scmp.eq.s32.totalorder %s1402_s16, 1 }
   0x9   : > { %p90_p3 = scmp.ne.s32.totalorder %s1347_s13, %s1343_s12  ;;  %p91_p4 = scmp.eq.s32.totalorder %s925_s17, 1 }
   0xa   : > { %s1417_s21 = scalar_select %p72_p1, %s1351_s14, %s74_s19  }
   0xb   : > { %p1419_p5 = por %p85_p2, %p84_p0  ;;  %p1423_p6 = por %p91_p4, %p90_p3 }
   0xc   : > { %p928_p7 = scmp.ge.s32.totalorder %s1355_s15, 1  ;;  %p147_p8 = scmp.lt.s32.totalorder %s1355_s15, 3 }
   0xe   : > { %p148_p9 = pnand %p928_p7, %p147_p8 }
   0xf   : > { %s1436_s28 = sshll.u32 (!%p148_p9), %s1402_s16, 5  ;;  %s1481_s9 = sand.u32 (!%p148_p9), 1, %s1347_s13  }
  0x10   : > { %151 = sbr.rel (%p148_p9) target bundleno = 333 (0x14d), region = 28  ;;  %p177_p10 = scmp.lt.s32.totalorder (!%p148_p9), %s1436_s28, 63 }
  0x11   : > { %s929_s10 = sshll.u32 (!%p148_p9), %s1481_s9, 7  ;;  %s1039_s17 = sshll.u32 (!%p148_p9), %s1402_s16, 11 }
  0x12   : > { %s1486_s11 = scalar_lea.vmem (!%p148_p9), [#allocation2], %s929_s10  ;;  %s1551_s25 = scalar_lea.hbm (!%p148_p9), %s1673_s2, %s1039_s17 }
  0x13   : > { %s818_s19 = sshll.u32 (!%p148_p9), %s1486_s11, 4  ;;  %s800_s16 = scalar_lea.sflag (!%p148_p9), [#allocation3], %s1481_s9  ;;  %s1553_s19 = int_to_ptr.vmem [resolvable:$true] %s818_s19 }
  0x14   : > { %s1265_s26 = scalar_lea.vmem (!%p148_p9), %s1553_s19, 2048  ;;  %s1357_s27 = smov (!%p148_p9), [#allocation2]  }
  0x15   : > { %v1246_v0 = vld [vmem:[%s1672_s1 + $0x10] ss:$0 sps:$4 sm:$0x33]   ;;  %vm365_vm0 = vcmask 1041408   ;;  %v1247_v1 = vld [vmem:[%s1672_s1 + $0x8] sm:$0xff]   ;;  %v1248_v3 = vld [vmem:[%s1672_s1] sm:$0xff]   ;;  %p1266_p11 = scmp.ne.s32.totalorder %s1553_s19, %s1265_s26 }
  0x16   : > { %1198 = vmatprep.subr.msk.bf16.mxu0 %vm365_vm0, %v1246_v0  ;;  %v367_v2 = vsel %vm365_vm0, %v1246_v0, 0  ;;  %1199 = vmatprep.subr.msk.bf16.mxu1 %vm365_vm0, %v1246_v0  ;;  %s178_s4 = scalar_select %p177_p10, %s1436_s28, 63  ;;  %vm316_vm1 = vcmask 293888  }
  0x17   : > { %1155 = vmatpush3.bf16.msra.mxu0 %v367_v2  ;;  %1195 = vmatpush3.bf16.msra.mxu1 %v367_v2  ;;  %p1267_p12 = pnand %p1266_p11, %p1419_p5  ;;  %s1269_s29 = sshll.u32 %s1357_s27, 4  ;;  %s1270_s29 = int_to_ptr.vmem [resolvable:$false] %s1269_s29 }
  0x18   : > { %1156 = vmatprep.subr.bf16.mxu0 %v1247_v1  ;;  %1193 = vmatprep.subr.bf16.mxu1 %v1247_v1  ;;  %s932_s5 = sshll.u32 %s178_s4, 2  ;;  %s1271_s30 = scalar_lea.vmem %s1270_s29, 4096 }
  0x19   : > { %s1446_s8 = scalar_lea.vmem %s1671_s0, %s932_s5  ;;  %p1268_p13 = pneg %p1267_p12 }
  0x1a   : > { %v1249_v4 = vld [vmem:[%s1446_s8] sm:$0xff]   ;;  %v1250_v5 = vld [vmem:[%s1446_s8 + $0x8] sm:$0xff]   ;;  %v1251_v6 = vld [vmem:[%s1446_s8 + $0x10] sm:$0xff]   ;;  %p1272_p0 = scmp.lt.s32.totalorder %s1553_s19, %s1270_s29  ;;  %p1273_p1 = scmp.lt.s32.totalorder %s1271_s30, %s1265_s26 }
  0x1b   : > { %1157 = vmatpush3.bf16.msra.mxu0 %v1247_v1  ;;  %1196 = vmatpush3.bf16.msra.mxu1 %v1247_v1  ;;  %v1252_v7 = vld [vmem:[%s1446_s8 + $0x18] sm:$0xff]   ;;  %v1253_v8 = vld [vmem:[%s1446_s8 + $0x20] sm:$0xff]   ;;  %v1258_v10 = vld [vmem:[%s1446_s8 + $0x48] sm:$0xff]  }
  0x1c   : > { %1158 = vmatprep.subr.bf16.mxu0 %v1248_v3  ;;  %1194 = vmatprep.subr.bf16.mxu1 %v1248_v3  ;;  %v1257_v9 = vld [vmem:[%s1446_s8 + $0x40] sm:$0xff]   ;;  %v1259_v11 = vld [vmem:[%s1446_s8 + $0x50] sm:$0xff]   ;;  %v1260_v12 = vld [vmem:[%s1446_s8 + $0x58] sm:$0xff]   ;;  %p1274_p2 = por %p1273_p1, %p1272_p0 }
  0x1d   : > { %1160 = vmatprep.mubr.msk.bf16.mxu0 %vm316_vm1, %v1249_v4  ;;  %1176 = vmatprep.mubr.msk.bf16.mxu1 %vm316_vm1, %v1257_v9  ;;  %v1261_v13 = vld [vmem:[%s1446_s8 + $0x60] sm:$0xff]   ;;  %v1254_v14 = vld [vmem:[%s1446_s8 + $0x28] sm:$0xff]   ;;  %v1255_v15 = vld [vmem:[%s1446_s8 + $0x30] sm:$0xff]  }
  0x1e   : > { %v1262_v16 = vld [vmem:[%s1446_s8 + $0x68] sm:$0xff]   ;;  %v1263_v17 = vld [vmem:[%s1446_s8 + $0x70] sm:$0xff]   ;;  %v1256_v18 = vld [vmem:[%s1446_s8 + $0x38] sm:$0xff]   ;;  %p1275_p3 = pnand %p1274_p2, %p1268_p13 }
  0x1f   : > { %1159 = vmatpush3.bf16.msra.mxu0 %v1248_v3  ;;  %1197 = vmatpush3.bf16.msra.mxu1 %v1248_v3  ;;  %v1264_v19 = vld [vmem:[%s1446_s8 + $0x78] sm:$0xff]  }
  0x22   : > { %1161 = vmatmul.mubr.msk.bf16.vlgmr.msra.gmra.mxu0 %vm316_vm1, %v1250_v5  ;;  %1177 = vmatmul.mubr.msk.bf16.vlgmr.msra.gmra.mxu1 %vm316_vm1, %v1258_v10 }
  0x23   : > { %1164 = vmatprep.mubr.msk.bf16.mxu0 %vm316_vm1, %v1251_v6  ;;  %1180 = vmatprep.mubr.msk.bf16.mxu1 %vm316_vm1, %v1259_v11 }
  0x2a   : > { %1165 = vmatmul.mubr.msk.bf16.gmra.mxu0 %vm316_vm1, %v1252_v7  ;;  %1181 = vmatmul.mubr.msk.bf16.gmra.mxu1 %vm316_vm1, %v1260_v12 }
  0x2b   : > { %1168 = vmatprep.mubr.msk.bf16.mxu0 %vm316_vm1, %v1253_v8  ;;  %1184 = vmatprep.mubr.msk.bf16.mxu1 %vm316_vm1, %v1261_v13 }
  0x32   : > { %1169 = vmatmul.mubr.msk.bf16.gmra.mxu0 %vm316_vm1, %v1254_v14  ;;  %1185 = vmatmul.mubr.msk.bf16.gmra.mxu1 %vm316_vm1, %v1262_v16 }
  0x33   : > { %1172 = vmatprep.mubr.msk.bf16.mxu0 %vm316_vm1, %v1255_v15  ;;  %1188 = vmatprep.mubr.msk.bf16.mxu1 %vm316_vm1, %v1263_v17 }
  0x3a   : > { %1173 = vmatmul.mubr.msk.bf16.gmra.mxu0 %vm316_vm1, %v1256_v18  ;;  %1189 = vmatmul.mubr.msk.bf16.gmra.mxu1 %vm316_vm1, %v1264_v19 }
  0xe2   : > { %v1162_v20 = vpop.f32.mrf.mxu0  ;;  %v1484_v25 = vpop.f32.mrf.mxu1 }
  0xe3   : > { %v729_v32 = vmul.f32 %v1162_v20, %v1162_v20 }
  0xe4   : > { %v403_v21 = vpop.f32.mrf.mxu0  ;;  %v1489_v31 = vpop.f32.mrf.mxu1 }
  0xe5   : > { %v727_v26 = vmul.f32 %v403_v21, %v403_v21 }
  0xe6   : > { %v1163_v22 = vpop.f32.mrf.mxu0  ;;  %v1492_v36 = vpop.f32.mrf.mxu1 }
  0xe7   : > { %v1048_v23 = vpack.c.bf16 %v1163_v22, %v1162_v20  ;;  %v730_v37 = vmul.f32 %v1163_v22, %v1163_v22  ;;  %v1088_v40 = vpack.c.bf16 %v1492_v36, %v1484_v25 }
  0xe8   : > { %v406_v24 = vpop.f32.mrf.mxu0  ;;  %v1496_v42 = vpop.f32.mrf.mxu1 }
  0xe9   : > { %1120 = vst [vmem:[%s1486_s11 + $0x8] sm:$0xff] %v1048_v23   ;;  %v1043_v27 = vpack.c.bf16 %v406_v24, %v403_v21  ;;  %v690_v28 = vadd.f32 %v406_v24, %v403_v21  ;;  %v728_v29 = vmul.f32 %v406_v24, %v406_v24  ;;  %1128 = vst [vmem:[%s1486_s11 + $0x48] sm:$0xff] %v1088_v40  }
  0xea   : > { %v1166_v30 = vpop.f32.mrf.mxu0  ;;  %v1083_v48 = vpack.c.bf16 %v1496_v42, %v1489_v31  ;;  %v1501_v49 = vpop.f32.mrf.mxu1 }
  0xeb   : > { %1044 = vst [vmem:[%s1486_s11] sm:$0xff] %v1043_v27   ;;  %v691_v33 = vadd.f32 %v1162_v20, %v690_v28  ;;  %v759_v34 = vadd.f32 %v728_v29, %v727_v26  ;;  %v733_v56 = vmul.f32 %v1166_v30, %v1166_v30 }
  0xec   : > { %v419_v35 = vpop.f32.mrf.mxu0  ;;  %1127 = vst [vmem:[%s1486_s11 + $0x40] sm:$0xff] %v1083_v48   ;;  %v1505_v55 = vpop.f32.mrf.mxu1 }
  0xed   : > { %v760_v38 = vadd.f32 %v759_v34, %v729_v32  ;;  %v692_v39 = vadd.f32 %v1163_v22, %v691_v33  ;;  %v731_v44 = vmul.f32 %v419_v35, %v419_v35 }
  0xee   : > { %v1167_v41 = vpop.f32.mrf.mxu0  ;;  %v1508_v60 = vpop.f32.mrf.mxu1 }
  0xef   : > { %v693_v43 = vadd.f32 %v692_v39, %v419_v35  ;;  %v761_v45 = vadd.f32 %v760_v38, %v730_v37  ;;  %v1058_v46 = vpack.c.bf16 %v1167_v41, %v1166_v30  ;;  %v734_v61 = vmul.f32 %v1167_v41, %v1167_v41 }
  0xf0   : > { %v422_v47 = vpop.f32.mrf.mxu0  ;;  %v1098_v0 = vpack.c.bf16 %v1508_v60, %v1501_v49  ;;  %v1512_v2 = vpop.f32.mrf.mxu1 }
  0xf1   : > { %v762_v50 = vadd.f32 %v761_v45, %v731_v44  ;;  %1122 = vst [vmem:[%s1486_s11 + $0x18] sm:$0xff] %v1058_v46   ;;  %v1053_v51 = vpack.c.bf16 %v422_v47, %v419_v35  ;;  %v694_v52 = vadd.f32 %v693_v43, %v422_v47  ;;  %v732_v53 = vmul.f32 %v422_v47, %v422_v47 }
  0xf2   : > { %v1170_v54 = vpop.f32.mrf.mxu0  ;;  %1130 = vst [vmem:[%s1486_s11 + $0x58] sm:$0xff] %v1098_v0   ;;  %v1093_v8 = vpack.c.bf16 %v1512_v2, %v1505_v55  ;;  %v1517_v9 = vpop.f32.mrf.mxu1 }
  0xf3   : > { %1121 = vst [vmem:[%s1486_s11 + $0x10] sm:$0xff] %v1053_v51   ;;  %v695_v57 = vadd.f32 %v1166_v30, %v694_v52  ;;  %v763_v58 = vadd.f32 %v762_v50, %v732_v53  ;;  %v737_v16 = vmul.f32 %v1170_v54, %v1170_v54  ;;  %v743_v53 = vmul.f32 %v1489_v31, %v1489_v31 }
  0xf4   : > { %v435_v59 = vpop.f32.mrf.mxu0  ;;  %1129 = vst [vmem:[%s1486_s11 + $0x50] sm:$0xff] %v1093_v8   ;;  %v1521_v15 = vpop.f32.mrf.mxu1 }
  0xf5   : > { %v764_v62 = vadd.f32 %v763_v58, %v733_v56  ;;  %v696_v63 = vadd.f32 %v1167_v41, %v695_v57  ;;  %v735_v4 = vmul.f32 %v435_v59, %v435_v59 }
  0xf6   : > { %v1171_v1 = vpop.f32.mrf.mxu0  ;;  %v1524_v20 = vpop.f32.mrf.mxu1 }
  0xf7   : > { %v697_v3 = vadd.f32 %v696_v63, %v435_v59  ;;  %v765_v5 = vadd.f32 %v764_v62, %v734_v61  ;;  %v1068_v6 = vpack.c.bf16 %v1171_v1, %v1170_v54  ;;  %v738_v21 = vmul.f32 %v1171_v1, %v1171_v1 }
  0xf8   : > { %v438_v7 = vpop.f32.mrf.mxu0  ;;  %v1108_v24 = vpack.c.bf16 %v1524_v20, %v1517_v9  ;;  %v1528_v27 = vpop.f32.mrf.mxu1 }
  0xf9   : > { %v766_v10 = vadd.f32 %v765_v5, %v735_v4  ;;  %1124 = vst [vmem:[%s1486_s11 + $0x28] sm:$0xff] %v1068_v6   ;;  %v1063_v11 = vpack.c.bf16 %v438_v7, %v435_v59  ;;  %v698_v12 = vadd.f32 %v697_v3, %v438_v7  ;;  %v736_v13 = vmul.f32 %v438_v7, %v438_v7 }
  0xfa   : > { %v1174_v14 = vpop.f32.mrf.mxu0  ;;  %1132 = vst [vmem:[%s1486_s11 + $0x68] sm:$0xff] %v1108_v24   ;;  %v1103_v34 = vpack.c.bf16 %v1528_v27, %v1521_v15  ;;  %v1533_v35 = vpop.f32.mrf.mxu1  ;;  %v744_v59 = vmul.f32 %v1496_v42, %v1496_v42 }
  0xfb   : > { %1123 = vst [vmem:[%s1486_s11 + $0x20] sm:$0xff] %v1063_v11   ;;  %v699_v17 = vadd.f32 %v1170_v54, %v698_v12  ;;  %v767_v18 = vadd.f32 %v766_v10, %v736_v13  ;;  %v741_v43 = vmul.f32 %v1174_v14, %v1174_v14 }
  0xfc   : > { %v451_v19 = vpop.f32.mrf.mxu0  ;;  %1131 = vst [vmem:[%s1486_s11 + $0x60] sm:$0xff] %v1103_v34   ;;  %v1537_v41 = vpop.f32.mrf.mxu1 }
  0xfd   : > { %v768_v22 = vadd.f32 %v767_v18, %v737_v16  ;;  %v700_v23 = vadd.f32 %v1171_v1, %v699_v17  ;;  %v739_v29 = vmul.f32 %v451_v19, %v451_v19 }
  0xfe   : > { %v1175_v26 = vpop.f32.mrf.mxu0  ;;  %v1542_v46 = vpop.f32.mrf.mxu1 }
  0xff   : > { %v701_v28 = vadd.f32 %v700_v23, %v451_v19  ;;  %v769_v30 = vadd.f32 %v768_v22, %v738_v21  ;;  %v1078_v32 = vpack.c.bf16 %v1175_v26, %v1174_v14  ;;  %v742_v47 = vmul.f32 %v1175_v26, %v1175_v26 }
 0x100   : > { %v454_v33 = vpop.f32.mrf.mxu0  ;;  %v1118_v51 = vpack.c.bf16 %v1542_v46, %v1533_v35  ;;  %v1546_v52 = vpop.f32.mrf.mxu1 }
 0x101   : > { %v770_v37 = vadd.f32 %v769_v30, %v739_v29  ;;  %1126 = vst [vmem:[%s1486_s11 + $0x38] sm:$0xff] %v1078_v32   ;;  %v1073_v38 = vpack.c.bf16 %v454_v33, %v451_v19  ;;  %v702_v39 = vadd.f32 %v701_v28, %v454_v33  ;;  %v740_v40 = vmul.f32 %v454_v33, %v454_v33 }
 0x102   : > { %1134 = vst [vmem:[%s1486_s11 + $0x78] sm:$0xff] %v1118_v51   ;;  %v1113_v57 = vpack.c.bf16 %v1546_v52, %v1537_v41 }
 0x103   : > { %1125 = vst [vmem:[%s1486_s11 + $0x30] sm:$0xff] %v1073_v38   ;;  %v703_v44 = vadd.f32 %v1174_v14, %v702_v39  ;;  %v771_v45 = vadd.f32 %v770_v37, %v740_v40 }
 0x104   : > { %1133 = vst [vmem:[%s1486_s11 + $0x70] sm:$0xff] %v1113_v57  }
 0x105   : > { %v704_v48 = vadd.f32 %v1175_v26, %v703_v44  ;;  %v772_v50 = vadd.f32 %v771_v45, %v741_v43 }
 0x107   : > { %v773_v54 = vadd.f32 %v772_v50, %v742_v47  ;;  %v705_v56 = vadd.f32 %v704_v48, %v1489_v31 }
 0x109   : > { %v706_v58 = vadd.f32 %v705_v56, %v1496_v42  ;;  %v774_v61 = vadd.f32 %v773_v54, %v743_v53 }
 0x10a   : > { %1278 = shalt.err (!%p1275_p3)
}
 0x10b   : > { %s1279_s4 = scalar_lea.hbm %s1551_s25, 2048  ;;  %s1283_s7 = scalar_lea.hbm %s1673_s2, 4096 }
 0x10c   : > { %p1280_p4 = scmp.ne.s32.totalorder %s1551_s25, %s1279_s4  ;;  %p1284_p9 = scmp.lt.s32.totalorder %s1551_s25, %s1673_s2 }
 0x10d   : > { %p1285_p10 = scmp.lt.s32.totalorder %s1283_s7, %s1279_s4 }
 0x10e   : > { %p1281_p7 = pnand %p1280_p4, %p1419_p5 }
 0x10f   : > { %p1286_p11 = por %p1285_p10, %p1284_p9 }
 0x110   : > { %p1282_p8 = pneg %p1281_p7 }
 0x112   : > { %p1287_p12 = pnand %p1286_p11, %p1282_p8 }
 0x114   : > { %1290 = shalt.err (!%p1287_p12)
}
 0x115   : > { %s1358_s11 = smov 64   ;;  %s1359_s17 = smov 4   ;;  %v745_v31 = vmul.f32 %v1484_v25, %v1484_v25  ;;  %v707_v42 = vadd.f32 %v1484_v25, %v706_v58  ;;  %v775_v62 = vadd.f32 %v774_v61, %v744_v59  ;;  %v746_v63 = vmul.f32 %v1492_v36, %v1492_v36 }
 0x116   : > { %1200 = dma.vmem_to_hbm [thread:$0]  (%p1419_p5), %s1553_s19, 2048, %s1551_s25, %s800_s16, %s1358_s11, %s1358_s11, %s1359_s17   ;;  %v747_v4 = vmul.f32 %v1505_v55, %v1505_v55  ;;  %v748_v8 = vmul.f32 %v1512_v2, %v1512_v2  ;;  %v749_v25 = vmul.f32 %v1501_v49, %v1501_v49  ;;  %v751_v14 = vmul.f32 %v1521_v15, %v1521_v15 }
 0x117   : > { %v776_v0 = vadd.f32 %v775_v62, %v745_v31  ;;  %v708_v1 = vadd.f32 %v1492_v36, %v707_v42  ;;  %v750_v36 = vmul.f32 %v1508_v60, %v1508_v60  ;;  %v752_v18 = vmul.f32 %v1528_v27, %v1528_v27  ;;  %s930_s19 = sshll.u32 %s1481_s9, 1  ;;  %s1635_s26 = scalar_lea.hbm %s1674_s3, %s1436_s28 }
 0x118   : > { %v755_v24 = vmul.f32 %v1537_v41, %v1537_v41  ;;  %v757_v29 = vmul.f32 %v1533_v35, %v1533_v35  ;;  %s175_s20 = scalar_lea.vmem [#allocation4], %s930_s19  ;;  %vm796_vm2 = vcmask 1040384   ;;  %s805_s27 = scalar_lea.sflag [#allocation5], %s1481_s9 }
 0x119   : > { %v709_v3 = vadd.f32 %v708_v1, %v1505_v55  ;;  %v777_v5 = vadd.f32 %v776_v0, %v746_v63  ;;  %s834_s24 = sshll.u32 %s175_s20, 4  ;;  %s1360_s30 = smov [#allocation4]   ;;  %s835_s24 = int_to_ptr.vmem [resolvable:$true] %s834_s24 }
 0x11a   : > { %s1291_s29 = scalar_lea.vmem %s835_s24, 32  ;;  %s1295_s4 = sshll.u32 %s1360_s30, 4  ;;  %s1296_s4 = int_to_ptr.vmem [resolvable:$false] %s1295_s4 }
 0x11b   : > { %v778_v6 = vadd.f32 %v777_v5, %v747_v4  ;;  %v710_v7 = vadd.f32 %v709_v3, %v1512_v2  ;;  %p1292_p13 = scmp.ne.s32.totalorder %s835_s24, %s1291_s29  ;;  %s1297_s5 = scalar_lea.vmem %s1296_s4, 64 }
 0x11c   : > { %p1298_p2 = scmp.lt.s32.totalorder %s835_s24, %s1296_s4  ;;  %p1299_p3 = scmp.lt.s32.totalorder %s1297_s5, %s1291_s29 }
 0x11d   : > { %v711_v10 = vadd.f32 %v1501_v49, %v710_v7  ;;  %v779_v11 = vadd.f32 %v778_v6, %v748_v8  ;;  %v753_v49 = vmul.f32 %v1517_v9, %v1517_v9  ;;  %p1293_p0 = pnand %p1292_p13, %p1419_p5 }
 0x11e   : > { %p1300_p4 = por %p1299_p3, %p1298_p2 }
 0x11f   : > { %v780_v12 = vadd.f32 %v779_v11, %v749_v25  ;;  %v712_v13 = vadd.f32 %v1508_v60, %v711_v10  ;;  %v754_v60 = vmul.f32 %v1524_v20, %v1524_v20  ;;  %p1294_p1 = pneg %p1293_p0 }
 0x121   : > { %v713_v55 = vadd.f32 %v712_v13, %v1521_v15  ;;  %v781_v16 = vadd.f32 %v780_v12, %v750_v36  ;;  %p1301_p7 = pnand %p1300_p4, %p1294_p1 }
 0x123   : > { %v782_v17 = vadd.f32 %v781_v16, %v751_v14  ;;  %v714_v2 = vadd.f32 %v713_v55, %v1528_v27 }
 0x125   : > { %v715_v19 = vadd.f32 %v1517_v9, %v714_v2  ;;  %v783_v21 = vadd.f32 %v782_v17, %v752_v18  ;;  %v756_v9 = vmul.f32 %v1546_v52, %v1546_v52 }
 0x127   : > { %v784_v22 = vadd.f32 %v783_v21, %v753_v49  ;;  %v716_v23 = vadd.f32 %v1524_v20, %v715_v19  ;;  %v758_v20 = vmul.f32 %v1542_v46, %v1542_v46 }
 0x129   : > { %v717_v15 = vadd.f32 %v716_v23, %v1537_v41  ;;  %v785_v26 = vadd.f32 %v784_v22, %v754_v60 }
 0x12b   : > { %v786_v27 = vadd.f32 %v785_v26, %v755_v24  ;;  %v718_v28 = vadd.f32 %v717_v15, %v1546_v52 }
 0x12d   : > { %v719_v30 = vadd.f32 %v1533_v35, %v718_v28  ;;  %v787_v32 = vadd.f32 %v786_v27, %v756_v9 }
 0x12f   : > { %v720_v33 = vadd.f32 %v1542_v46, %v719_v30  ;;  %v788_v34 = vadd.f32 %v787_v32, %v757_v29 }
 0x131   : > { %v721_v37 = vrot.slane %v720_v33, 4  ;;  %v789_v38 = vadd.f32 %v788_v34, %v758_v20 }
 0x133   : > { %v722_v39 = vadd.f32 %v721_v37, %v720_v33  ;;  %v790_v40 = vrot.slane %v789_v38, 4 }
 0x135   : > { %v723_v41 = vrot.slane %v722_v39, 2  ;;  %v791_v43 = vadd.f32 %v790_v40, %v789_v38 }
 0x137   : > { %v724_v44 = vadd.f32 %v723_v41, %v722_v39  ;;  %v792_v45 = vrot.slane %v791_v43, 2 }
 0x139   : > { %v725_v35 = vrot.slane %v724_v44, 1  ;;  %v793_v47 = vadd.f32 %v792_v45, %v791_v43 }
 0x13b   : > { %v794_v48 = vrot.slane %v793_v47, 1  ;;  %v726_v46 = vadd.f32 %v725_v35, %v724_v44 }
 0x13d   : > { %v795_v50 = vadd.f32 %v794_v48, %v793_v47 }
 0x13f   : > { %v797_v51 = vsel %vm796_vm2, %v726_v46, %v795_v50 }
 0x140   : > { %798 = vst [vmem:[%s175_s20] sm:$0x3] %v797_v51 }
 0x141   : > { %1304 = shalt.err (!%p1301_p7)
}
 0x142   : > { %s1305_s28 = scalar_lea.hbm %s1635_s26, 32  ;;  %s1309_s7 = scalar_lea.hbm %s1674_s3, 64 }
 0x143   : > { %p1306_p8 = scmp.ne.s32.totalorder %s1635_s26, %s1305_s28  ;;  %p1310_p11 = scmp.lt.s32.totalorder %s1635_s26, %s1674_s3 }
 0x144   : > { %p1311_p12 = scmp.lt.s32.totalorder %s1309_s7, %s1305_s28 }
 0x145   : > { %p1307_p9 = pnand %p1306_p8, %p1419_p5 }
 0x146   : > { %p1312_p13 = por %p1311_p12, %p1310_p11 }
 0x147   : > { %p1308_p10 = pneg %p1307_p9 }
 0x149   : > { %p1313_p0 = pnand %p1312_p13, %p1308_p10 }
 0x14b   : > { %1316 = shalt.err (!%p1313_p0)
}
 0x14c   : > { %1201 = dma.vmem_to_hbm [thread:$0]  (%p1419_p5), %s835_s24, 32, %s1635_s26, %s805_s27  }
 0x14d PF: > { %p1211_p1 = scmp.ge.s32.totalorder %s1355_s15, 2  ;;  %s846_s11 = sand.u32 1, %s1343_s12  }
 0x14e   : > { %s847_s17 = scalar_lea.sflag [#allocation3], %s846_s11 }
 0x14f   : > { %p1205_p2 = pnand %p1211_p1, %p1423_p6 }
 0x151   : > { %p1206_p3 = pneg %p1205_p2 }
 0x153   : > { %1334 = dma.done.wait (%p1206_p3), %s847_s17, 2048  }
 0x154   : > { %1336 = vsyncadd (%p1206_p3), %s847_s17, 4294965248  ;;  %s856_s19 = scalar_lea.sflag [#allocation5], %s846_s11 }
 0x155   : > { %1338 = dma.done.wait (%p1206_p3), %s856_s19, 32  }
 0x156   : > { %1340 = vsyncadd (%p1206_p3), %s856_s19, 4294967264  ;;  %p17_p5 = scmp.ge.s32.totalorder %s1406_s18, 4   ;;  %s1677_s12 = smov %s1347_s13 }
 0x157   : > { %s1678_s13 = smov %s1351_s14  ;;  %s1679_s14 = smov %s1417_s21 }
 0x158   : > { %s1680_s15 = smov %s1406_s18  ;;  %19 = sbr.rel (!%p17_p5) target bundleno = 5 (0x5), region = 80 }
 0x15d   :  { %861 = vsyncpa [#allocation3], 1 }
 0x15e   :  { %863 = vsyncpa [#allocation3 + $0x1], 1 }
 0x15f   :  { %864 = vsyncpa [#allocation5], 1 }
 0x160   :  { %866 = vsyncpa [#allocation5 + $0x1], 1 }

</bundles_post_ra>
